<compile_context>
chip_gen: v7x
topology: tpu7x:2x2x1
jax: 0.10.0
libtpu: 0.0.40
codegen_flags: <defaults>
</compile_context>

<pallas_src>
import functools
import math

import jax
import jax.numpy as jnp
from jax import lax
from jax.experimental import pallas as pl
from jax.experimental.pallas import tpu as pltpu

_SQRT_HALF = 0.7071067811865476      # 1 / sqrt(2)
_SQRT_2_OVER_PI = 0.7978845608028654  # sqrt(2 / pi)


def _round_up(x, m):
    return (x + m - 1) // m * m


def _vmem_capacity_bytes():
    """Per-core VMEM capacity; conservative (v7x) fallback if the query fails."""
    try:
        info = pltpu.get_tpu_info()
        cap = getattr(info, "vmem_capacity_bytes", None)
        if cap:
            return int(cap)
    except Exception:
        pass
    return 64 * 1024 * 1024


def _mlp_block_kernel(x_ref, w_ref, p_ref, o_ref, *, eps, approximate):
    # x_ref: (tm, C_in) token tile
    # w_ref: (C_in, C_out) full weight (transposed from PyTorch (out, in))
    # p_ref: (3, C_out)  row 0 = linear bias, row 1 = LN gamma, row 2 = LN beta
    # o_ref: (tm, C_out)
    # Matmul in the operands' native dtype (bf16 goes straight to the MXU), f32 accumulate.
    y = jnp.dot(x_ref[...], w_ref[...], preferred_element_type=jnp.float32)

    params = p_ref[...].astype(jnp.float32)
    bias = params[0:1, :]
    gamma = params[1:2, :]
    beta = params[2:3, :]

    y = y + bias

    c_out = y.shape[-1]
    inv_c = 1.0 / c_out
    # No padded lanes -> no masking needed for the statistics.
    mean = jnp.sum(y, axis=-1, keepdims=True) * inv_c
    centered = y - mean
    var = jnp.sum(centered * centered, axis=-1, keepdims=True) * inv_c

    y_norm = centered * lax.rsqrt(var + eps)
    y_norm = y_norm * gamma + beta

    if approximate:
        # tanh-approx GELU: tanh runs on the EUP (separate VLIW slot from the VALU).
        inner = _SQRT_2_OVER_PI * (y_norm + 0.044715 * (y_norm * y_norm * y_norm))
        gelu = 0.5 * y_norm * (1.0 + jnp.tanh(inner))
    else:
        # Exact GELU (PyTorch default): 0.5 * x * (1 + erf(x / sqrt(2))).
        gelu = 0.5 * y_norm * (1.0 + lax.erf(y_norm * _SQRT_HALF))

    o_ref[...] = gelu.astype(o_ref.dtype)


def prepare_params(w, b, gamma, beta):
    """One-time parameter prep (call once / cache; avoids per-call transpose HLO).

    w: (C_out, C_in) PyTorch nn.Linear weight layout.
    Returns (w_t, params) with w_t: (C_in, C_out), params: (3, C_out).
    """
    w_t = jnp.asarray(w).T
    params = jnp.stack(
        [jnp.asarray(b), jnp.asarray(gamma), jnp.asarray(beta)], axis=0
    )
    return w_t, params


def mlp_block_prepared(x, w_t, params, *, eps=1e-5, approximate_gelu=False,
                       block_rows=512):
    """Fused Linear + LayerNorm + GELU using pre-prepared parameters."""
    orig_shape = x.shape
    c_in = orig_shape[-1]
    c_out = w_t.shape[1]

    x2d = x.reshape(-1, c_in)          # free (contiguous) reshape, no HBM pass
    n = x2d.shape[0]

    x_item = int(jnp.dtype(x.dtype).itemsize)
    w_item = int(jnp.dtype(w_t.dtype).itemsize)
    out_item = x_item

    c_in_lanes = _round_up(c_in, 128)
    c_out_lanes = _round_up(c_out, 128)

    # ---- Generation-aware VMEM budgeting ----
    vmem_cap = _vmem_capacity_bytes()
    vmem_limit = min(int(vmem_cap * 0.75), 96 * 1024 * 1024)
    vmem_budget = min(int(vmem_cap * 0.5), 64 * 1024 * 1024)

    # Single-buffered params (constant index map) + per-row cost of double-buffered
    # x / out tiles plus f32 epilogue intermediates (y, centered, y_norm, ...).
    param_bytes = c_in_lanes * c_out_lanes * w_item + 8 * c_out_lanes * w_item
    per_row_bytes = (2 * c_in_lanes * x_item          # x tile, double-buffered
                     + 2 * c_out_lanes * out_item     # out tile, double-buffered
                     + 4 * c_out_lanes * 4            # f32 intermediates headroom
                     + c_in_lanes * 4)
    row_granule = 16 if x_item == 2 else 8

    tm = (vmem_budget - param_bytes) // max(per_row_bytes, 1)
    tm = max(row_granule, min(int(tm), block_rows, _round_up(max(n, 1), row_granule)))
    # Align to hardware granules (MXU M dim / sublane packing).
    if tm >= 256:
        tm = (tm // 256) * 256
    elif tm >= 128:
        tm = (tm // 128) * 128
    else:
        tm = max(row_granule, (tm // row_granule) * row_granule)
    # Ensure >= 2 grid steps when there is enough work so both v7x TensorCores are used
    # ("parallel" axis); harmless on single-TC v5e/v6e.
    if n > row_granule and pl.cdiv(n, tm) < 2:
        tm = max(row_granule, _round_up(pl.cdiv(n, 2), row_granule))

    grid = (pl.cdiv(n, tm),)           # ragged last block handled by Pallas (clipped store)

    kernel = functools.partial(_mlp_block_kernel, eps=eps, approximate=approximate_gelu)

    cost = pl.CostEstimate(
        flops=int(2 * n * c_in * c_out),
        transcendentals=int(n * c_out),
        bytes_accessed=int(n * c_in * x_item
                           + (c_in * c_out + 3 * c_out) * w_item
                           + n * c_out * out_item),
    )

    def _run(single_buffer_params):
        if single_buffer_params:
            w_spec = pl.BlockSpec((c_in, c_out), lambda i: (0, 0),
                                  pipeline_mode=pl.Buffered(1))
            p_spec = pl.BlockSpec((3, c_out), lambda i: (0, 0),
                                  pipeline_mode=pl.Buffered(1))
        else:
            w_spec = pl.BlockSpec((c_in, c_out), lambda i: (0, 0))
            p_spec = pl.BlockSpec((3, c_out), lambda i: (0, 0))

        return pl.pallas_call(
            kernel,
            out_shape=jax.ShapeDtypeStruct((n, c_out), x.dtype),
            grid=grid,
            in_specs=[
                pl.BlockSpec((tm, c_in), lambda i: (i, 0)),   # x tile
                w_spec,                                       # full weight (constant index)
                p_spec,                                       # bias / gamma / beta
            ],
            out_specs=pl.BlockSpec((tm, c_out), lambda i: (i, 0)),
            compiler_params=pltpu.CompilerParams(
                dimension_semantics=("parallel",),
                vmem_limit_bytes=vmem_limit,
            ),
            cost_estimate=cost,
        )(x2d, w_t, params)

    try:
        out2d = _run(True)
    except Exception:
        # Fallback if this jax version rejects pl.Buffered(1) on constant blocks.
        out2d = _run(False)

    return out2d.reshape(*orig_shape[:-1], c_out)


def mlp_block(x, w, b, gamma, beta, *, eps=1e-5, approximate_gelu=False,
              block_rows=512):
    """Convenience wrapper taking raw PyTorch-layout parameters.

    For repeated calls (LION calls this layer many times per forward), prefer
    `prepare_params` once + `mlp_block_prepared`.
    """
    w_t, params = prepare_params(w, b, gamma, beta)
    return mlp_block_prepared(x, w_t, params, eps=eps,
                              approximate_gelu=approximate_gelu,
                              block_rows=block_rows)


def _reference(x, w, b, gamma, beta, eps=1e-5):
    # Pure-JAX reference mirroring PyTorch Linear -> LayerNorm -> GELU(exact).
    y = jnp.einsum("...i,oi->...o", x, w) + b
    mean = jnp.mean(y, axis=-1, keepdims=True)
    var = jnp.mean((y - mean) ** 2, axis=-1, keepdims=True)
    yn = (y - mean) / jnp.sqrt(var + eps)
    yn = yn * gamma + beta
    return 0.5 * yn * (1.0 + lax.erf(yn / jnp.sqrt(2.0)))


if __name__ == "__main__":
    key = jax.random.PRNGKey(0)

    # Small shapes consistent with the module: tokens over (batch=2, seq=8),
    # input_channel=32, out_channel=64 (deliberately not multiples of 128).
    batch, seq, c_in, c_out = 2, 8, 32, 64

    k_x, k_w, k_b = jax.random.split(key, 3)
    x = jax.random.normal(k_x, (batch, seq, c_in), dtype=jnp.float32)

    bound = 1.0 / math.sqrt(c_in)
    w = jax.random.uniform(k_w, (c_out, c_in), minval=-bound, maxval=bound,
                           dtype=jnp.float32)
    b = jax.random.uniform(k_b, (c_out,), minval=-bound, maxval=bound,
                           dtype=jnp.float32)
    gamma = jnp.ones((c_out,), dtype=jnp.float32)
    beta = jnp.zeros((c_out,), dtype=jnp.float32)

    # One-time parameter prep (cached across calls in real use).
    w_t, params = prepare_params(w, b, gamma, beta)

    out = mlp_block_prepared(x, w_t, params)
    out = jax.block_until_ready(out)
    ref = _reference(x, w, b, gamma, beta)
    assert out.shape == (batch, seq, c_out)
    assert jnp.allclose(out, ref, atol=2e-5, rtol=2e-5), "mismatch vs reference"

    # Second shape with a token count not divisible by the row tile, exercising the
    # ragged last grid block (no wrapper padding / slicing).
    x2 = jax.random.normal(jax.random.PRNGKey(1), (batch, seq - 1, c_in),
                           dtype=jnp.float32)
    out2 = jax.block_until_ready(mlp_block_prepared(x2, w_t, params))
    ref2 = _reference(x2, w, b, gamma, beta)
    assert out2.shape == (batch, seq - 1, c_out)
    assert jnp.allclose(out2, ref2, atol=2e-5, rtol=2e-5), "mismatch vs reference (ragged)"

    print("KERNEL_OK")
</pallas_src>

<mosaic_0001>
module attributes {stable_mosaic.version = 11 : i64} {
  func.func @_mlp_block_kernel(%arg0: i32, %arg1: memref<8x32xf32, #tpu.memory_space<vmem>>, %arg2: memref<32x64xf32, #tpu.memory_space<vmem>>, %arg3: memref<3x64xf32, #tpu.memory_space<vmem>>, %arg4: memref<8x64xf32, #tpu.memory_space<vmem>>) attributes {dimension_semantics = [#tpu.dimension_semantics<parallel>], iteration_bounds = array<i64: 2>, scalar_prefetch = 0 : i64, scratch_operands = 0 : i64, tpu.core_type = #tpu.core_type<tc>, window_params = [{transform_indices = @transform_0, window_bounds = array<i64: 8, 32>}, {pipeline_mode = #tpu.pipeline_mode<synchronous>, transform_indices = @transform_1, window_bounds = array<i64: 32, 64>}, {pipeline_mode = #tpu.pipeline_mode<synchronous>, transform_indices = @transform_2, window_bounds = array<i64: 3, 64>}, {transform_indices = @transform_3, window_bounds = array<i64: 8, 64>}]} {
    %c0 = arith.constant 0 : index
    %c0_0 = arith.constant 0 : index
    %0 = vector.load %arg1[%c0, %c0_0] : memref<8x32xf32, #tpu.memory_space<vmem>>, vector<8x32xf32>
    %c0_1 = arith.constant 0 : index
    %c0_2 = arith.constant 0 : index
    %1 = vector.load %arg2[%c0_1, %c0_2] : memref<32x64xf32, #tpu.memory_space<vmem>>, vector<32x64xf32>
    %cst = arith.constant dense<0.000000e+00> : vector<8x64xf32>
    %2 = tpu.matmul %0, %1, %cst {dimension_numbers = #tpu.dot_dimension_numbers<[1], [0], [0], [1], [0, 0, 1, 1], [], []>} : vector<8x32xf32>, vector<32x64xf32>, vector<8x64xf32> -> vector<8x64xf32>
    %c0_3 = arith.constant 0 : index
    %c0_4 = arith.constant 0 : index
    %3 = vector.load %arg3[%c0_3, %c0_4] : memref<3x64xf32, #tpu.memory_space<vmem>>, vector<3x64xf32>
    %4 = vector.extract_strided_slice %3 {offsets = [0, 0], sizes = [1, 64], strides = [1, 1]} : vector<3x64xf32> to vector<1x64xf32>
    %5 = vector.extract_strided_slice %3 {offsets = [1, 0], sizes = [1, 64], strides = [1, 1]} : vector<3x64xf32> to vector<1x64xf32>
    %6 = vector.extract_strided_slice %3 {offsets = [2, 0], sizes = [1, 64], strides = [1, 1]} : vector<3x64xf32> to vector<1x64xf32>
    %7 = vector.broadcast %4 : vector<1x64xf32> to vector<8x64xf32>
    %8 = arith.addf %2, %7 : vector<8x64xf32>
    %cst_5 = arith.constant dense<0.000000e+00> : vector<8xf32>
    %9 = vector.multi_reduction <add>, %8, %cst_5 [1] : vector<8x64xf32> to vector<8xf32>
    %10 = vector.shape_cast %9 : vector<8xf32> to vector<8x1xf32>
    %cst_6 = arith.constant 1.562500e-02 : f32
    %11 = vector.broadcast %cst_6 : f32 to vector<8x1xf32>
    %12 = arith.mulf %10, %11 : vector<8x1xf32>
    %13 = vector.broadcast %12 : vector<8x1xf32> to vector<8x64xf32>
    %14 = arith.subf %8, %13 : vector<8x64xf32>
    %15 = arith.mulf %14, %14 : vector<8x64xf32>
    %cst_7 = arith.constant dense<0.000000e+00> : vector<8xf32>
    %16 = vector.multi_reduction <add>, %15, %cst_7 [1] : vector<8x64xf32> to vector<8xf32>
    %17 = vector.shape_cast %16 : vector<8xf32> to vector<8x1xf32>
    %cst_8 = arith.constant 1.562500e-02 : f32
    %18 = vector.broadcast %cst_8 : f32 to vector<8x1xf32>
    %19 = arith.mulf %17, %18 : vector<8x1xf32>
    %cst_9 = arith.constant 9.99999974E-6 : f32
    %20 = vector.broadcast %cst_9 : f32 to vector<8x1xf32>
    %21 = arith.addf %19, %20 : vector<8x1xf32>
    %22 = math.rsqrt %21 : vector<8x1xf32>
    %23 = vector.broadcast %22 : vector<8x1xf32> to vector<8x64xf32>
    %24 = arith.mulf %14, %23 : vector<8x64xf32>
    %25 = vector.broadcast %5 : vector<1x64xf32> to vector<8x64xf32>
    %26 = arith.mulf %24, %25 : vector<8x64xf32>
    %27 = vector.broadcast %6 : vector<1x64xf32> to vector<8x64xf32>
    %28 = arith.addf %26, %27 : vector<8x64xf32>
    %cst_10 = arith.constant 5.000000e-01 : f32
    %29 = vector.broadcast %cst_10 : f32 to vector<8x64xf32>
    %30 = arith.mulf %29, %28 : vector<8x64xf32>
    %cst_11 = arith.constant 0.707106769 : f32
    %31 = vector.broadcast %cst_11 : f32 to vector<8x64xf32>
    %32 = arith.mulf %28, %31 : vector<8x64xf32>
    %33 = math.erf %32 : vector<8x64xf32>
    %cst_12 = arith.constant 1.000000e+00 : f32
    %34 = vector.broadcast %cst_12 : f32 to vector<8x64xf32>
    %35 = arith.addf %34, %33 : vector<8x64xf32>
    %36 = arith.mulf %30, %35 : vector<8x64xf32>
    %c0_13 = arith.constant 0 : index
    %c0_14 = arith.constant 0 : index
    %37 = vector.load %arg4[%c0_13, %c0_14] : memref<8x64xf32, #tpu.memory_space<vmem>>, vector<8x64xf32>
    tpu.vector_store %arg4[%c0_13, %c0_14], %36 {strides = array<i32>} : memref<8x64xf32, #tpu.memory_space<vmem>>, vector<8x64xf32>,
    return
  }
  func.func @transform_0(%arg0: i32) -> (i32, i32) {
    %c0_i32 = arith.constant 0 : i32
    %c0_i32_0 = arith.constant 0 : i32
    return %arg0, %c0_i32 : i32, i32
  }
  func.func @transform_1(%arg0: i32) -> (i32, i32) {
    %c0_i32 = arith.constant 0 : i32
    %c0_i32_0 = arith.constant 0 : i32
    %c0_i32_1 = arith.constant 0 : i32
    return %c0_i32, %c0_i32_0 : i32, i32
  }
  func.func @transform_2(%arg0: i32) -> (i32, i32) {
    %c0_i32 = arith.constant 0 : i32
    %c0_i32_0 = arith.constant 0 : i32
    %c0_i32_1 = arith.constant 0 : i32
    return %c0_i32, %c0_i32_0 : i32, i32
  }
  func.func @transform_3(%arg0: i32) -> (i32, i32) {
    %c0_i32 = arith.constant 0 : i32
    %c0_i32_0 = arith.constant 0 : i32
    return %arg0, %c0_i32 : i32, i32
  }
}

module attributes {stable_mosaic.version = 11 : i64} {
  func.func @_mlp_block_kernel(%arg0: i32, %arg1: memref<8x32xf32, #tpu.memory_space<vmem>>, %arg2: memref<32x64xf32, #tpu.memory_space<vmem>>, %arg3: memref<3x64xf32, #tpu.memory_space<vmem>>, %arg4: memref<8x64xf32, #tpu.memory_space<vmem>>) attributes {dimension_semantics = [#tpu.dimension_semantics<parallel>], iteration_bounds = array<i64: 2>, scalar_prefetch = 0 : i64, scratch_operands = 0 : i64, tpu.core_type = #tpu.core_type<tc>, window_params = [{transform_indices = @transform_0, window_bounds = array<i64: 8, 32>}, {pipeline_mode = #tpu.pipeline_mode<synchronous>, transform_indices = @transform_1, window_bounds = array<i64: 32, 64>}, {pipeline_mode = #tpu.pipeline_mode<synchronous>, transform_indices = @transform_2, window_bounds = array<i64: 3, 64>}, {transform_indices = @transform_3, window_bounds = array<i64: 8, 64>}]} {
    %c0 = arith.constant 0 : index
    %c0_0 = arith.constant 0 : index
    %0 = vector.load %arg1[%c0, %c0_0] : memref<8x32xf32, #tpu.memory_space<vmem>>, vector<8x32xf32>
    %c0_1 = arith.constant 0 : index
    %c0_2 = arith.constant 0 : index
    %1 = vector.load %arg2[%c0_1, %c0_2] : memref<32x64xf32, #tpu.memory_space<vmem>>, vector<32x64xf32>
    %cst = arith.constant dense<0.000000e+00> : vector<8x64xf32>
    %2 = tpu.matmul %0, %1, %cst {dimension_numbers = #tpu.dot_dimension_numbers<[1], [0], [0], [1], [0, 0, 1, 1], [], []>} : vector<8x32xf32>, vector<32x64xf32>, vector<8x64xf32> -> vector<8x64xf32>
    %c0_3 = arith.constant 0 : index
    %c0_4 = arith.constant 0 : index
    %3 = vector.load %arg3[%c0_3, %c0_4] : memref<3x64xf32, #tpu.memory_space<vmem>>, vector<3x64xf32>
    %4 = vector.extract_strided_slice %3 {offsets = [0, 0], sizes = [1, 64], strides = [1, 1]} : vector<3x64xf32> to vector<1x64xf32>
    %5 = vector.extract_strided_slice %3 {offsets = [1, 0], sizes = [1, 64], strides = [1, 1]} : vector<3x64xf32> to vector<1x64xf32>
    %6 = vector.extract_strided_slice %3 {offsets = [2, 0], sizes = [1, 64], strides = [1, 1]} : vector<3x64xf32> to vector<1x64xf32>
    %7 = vector.broadcast %4 : vector<1x64xf32> to vector<8x64xf32>
    %8 = arith.addf %2, %7 : vector<8x64xf32>
    %cst_5 = arith.constant dense<0.000000e+00> : vector<8xf32>
    %9 = vector.multi_reduction <add>, %8, %cst_5 [1] : vector<8x64xf32> to vector<8xf32>
    %10 = vector.shape_cast %9 : vector<8xf32> to vector<8x1xf32>
    %cst_6 = arith.constant 1.562500e-02 : f32
    %11 = vector.broadcast %cst_6 : f32 to vector<8x1xf32>
    %12 = arith.mulf %10, %11 : vector<8x1xf32>
    %13 = vector.broadcast %12 : vector<8x1xf32> to vector<8x64xf32>
    %14 = arith.subf %8, %13 : vector<8x64xf32>
    %15 = arith.mulf %14, %14 : vector<8x64xf32>
    %cst_7 = arith.constant dense<0.000000e+00> : vector<8xf32>
    %16 = vector.multi_reduction <add>, %15, %cst_7 [1] : vector<8x64xf32> to vector<8xf32>
    %17 = vector.shape_cast %16 : vector<8xf32> to vector<8x1xf32>
    %cst_8 = arith.constant 1.562500e-02 : f32
    %18 = vector.broadcast %cst_8 : f32 to vector<8x1xf32>
    %19 = arith.mulf %17, %18 : vector<8x1xf32>
    %cst_9 = arith.constant 9.99999974E-6 : f32
    %20 = vector.broadcast %cst_9 : f32 to vector<8x1xf32>
    %21 = arith.addf %19, %20 : vector<8x1xf32>
    %22 = math.rsqrt %21 : vector<8x1xf32>
    %23 = vector.broadcast %22 : vector<8x1xf32> to vector<8x64xf32>
    %24 = arith.mulf %14, %23 : vector<8x64xf32>
    %25 = vector.broadcast %5 : vector<1x64xf32> to vector<8x64xf32>
    %26 = arith.mulf %24, %25 : vector<8x64xf32>
    %27 = vector.broadcast %6 : vector<1x64xf32> to vector<8x64xf32>
    %28 = arith.addf %26, %27 : vector<8x64xf32>
    %cst_10 = arith.constant 5.000000e-01 : f32
    %29 = vector.broadcast %cst_10 : f32 to vector<8x64xf32>
    %30 = arith.mulf %29, %28 : vector<8x64xf32>
    %cst_11 = arith.constant 0.707106769 : f32
    %31 = vector.broadcast %cst_11 : f32 to vector<8x64xf32>
    %32 = arith.mulf %28, %31 : vector<8x64xf32>
    %33 = math.erf %32 : vector<8x64xf32>
    %cst_12 = arith.constant 1.000000e+00 : f32
    %34 = vector.broadcast %cst_12 : f32 to vector<8x64xf32>
    %35 = arith.addf %34, %33 : vector<8x64xf32>
    %36 = arith.mulf %30, %35 : vector<8x64xf32>
    %c0_13 = arith.constant 0 : index
    %c0_14 = arith.constant 0 : index
    %37 = vector.load %arg4[%c0_13, %c0_14] : memref<8x64xf32, #tpu.memory_space<vmem>>, vector<8x64xf32>
    tpu.vector_store %arg4[%c0_13, %c0_14], %36 {strides = array<i32>} : memref<8x64xf32, #tpu.memory_space<vmem>>, vector<8x64xf32>,
    return
  }
  func.func @transform_0(%arg0: i32) -> (i32, i32) {
    %c0_i32 = arith.constant 0 : i32
    %c0_i32_0 = arith.constant 0 : i32
    return %arg0, %c0_i32 : i32, i32
  }
  func.func @transform_1(%arg0: i32) -> (i32, i32) {
    %c0_i32 = arith.constant 0 : i32
    %c0_i32_0 = arith.constant 0 : i32
    %c0_i32_1 = arith.constant 0 : i32
    return %c0_i32, %c0_i32_0 : i32, i32
  }
  func.func @transform_2(%arg0: i32) -> (i32, i32) {
    %c0_i32 = arith.constant 0 : i32
    %c0_i32_0 = arith.constant 0 : i32
    %c0_i32_1 = arith.constant 0 : i32
    return %c0_i32, %c0_i32_0 : i32, i32
  }
  func.func @transform_3(%arg0: i32) -> (i32, i32) {
    %c0_i32 = arith.constant 0 : i32
    %c0_i32_0 = arith.constant 0 : i32
    return %arg0, %c0_i32 : i32, i32
  }
}

</mosaic_0001>

<bundles_post_ra>
// kernel: tpu_custom_call.1
= control target key start
LH: loop header
LB: loop body
LE: loop exit
PB: predicated region body
PF: predicated region fallthrough
CT: control target
= control target key end

     0   :  { %8 = vsyncpa [#allocation3], 0  ;;  %s876_s0 = inlined_call_operand.hbm [shape: f32[16,32], index: 0, kind: input, shape index: {}]   ;;  %s877_s1 = inlined_call_operand.hbm [shape: f32[32,64], index: 1, kind: input, shape index: {}]   ;;  %s878_s2 = inlined_call_operand.vmem [shape: f32[3,64], index: 2, kind: input, shape index: {}]   ;;  %s879_s3 = inlined_call_operand.hbm [shape: f32[16,64], index: 3, kind: output, shape index: {}]  }
   0x1   :  { %10 = vsyncpa [#allocation3 + $0x1], 0 }
   0x2   :  { %11 = vsyncpa [#allocation6], 0 }
   0x3   :  { %12 = vsyncpa [#allocation4], 0 }
   0x4   :  { %14 = vsyncpa [#allocation4 + $0x1], 0  ;;  %s670_s12 = smov 0   ;;  %s672_s13 = smov 0  }
   0x5   :  { %s674_s14 = smov 0   ;;  %s676_s15 = smov 0  }
   0x6 LB: > { %s691_s16 = sadd.s32 4294967295, %s640_s15   ;;  %s409_s17 = sadd.s32 4294967294, %s640_s15   ;;  %s640_s15 = sphi %s676_s15, %s899_s15   ;;  %s636_s14 = sphi %s674_s14, %s898_s14   ;;  %s632_s13 = sphi %s672_s13, %s897_s13   ;;  %s628_s12 = sphi %s670_s12, %s896_s12  }
   0x7   : > { %p40_p0 = scmp.ne.s32.totalorder %s632_s13, %s628_s12  ;;  %p880_p1 = scmp.eq.s32.totalorder %s691_s16, 0 }
   0x8   : > { %p112_p3 = scmp.eq.s32.totalorder %s409_s17, 1  ;;  %p410_p5 = scmp.ge.s32.totalorder %s640_s15, 1 }
   0x9   : > { %p700_p4 = por %p880_p1, %p40_p0  ;;  %p119_p7 = scmp.lt.s32.totalorder %s640_s15, 3 }
   0xa   : > { %p705_p6 = por %p112_p3, %p40_p0  ;;  %s642_s21 = smov [#allocation5]  }
   0xb   : > { %s883_s18 = scalar_select %p700_p4, 1, 0 }
   0xc   : > { %s884_s19 = scalar_select %p705_p6, 1, 0 }
   0xd   : > { %p710_p8 = pnand %p410_p5, %p119_p7  ;;  %s131_s22 = sshll.u32 %s642_s21, 4  ;;  %s714_s22 = int_to_ptr.vmem [resolvable:$true] %s131_s22 }
   0xe   : > { %s726_s24 = sadd.s32 1, %s640_s15   ;;  %s27_s25 = sadd.s32 1, %s636_s14 }
   0xf   : > { %s885_s20 = scalar_select %p710_p8, 1, 0 }
  0x10   : > { %p454_p9 = pneg %p710_p8  ;;  %s24_s26 = ssub.s32 %s640_s15, %s726_s24 }
  0x11   : > { %s512_s29 = scalar_lea.hbm %s877_s1, 512 }
  0x12   : > { %p721_p11 = pnand %p454_p9, %p880_p1  ;;  %p513_p12 = scmp.ne.s32.totalorder %s877_s1, %s512_s29 }
  0x13   : > { %p519_p5 = scmp.lt.u32.totalorder %s512_s29, %s877_s1 }
  0x14   : > { %p514_p13 = pneg %p721_p11 }
  0x16   : > { %p515_p0 = pnand %p514_p13, %p513_p12 }
  0x18   : > { %p516_p3 = pneg %p515_p0 }
  0x1a   : > { %p521_p7 = pnand %p519_p5, %p516_p3 }
  0x1c   : > { %524 = shalt.err (!%p521_p7)
}
  0x1d   : > { %s525_s7 = scalar_lea.vmem %s714_s22, 512  ;;  %p533_p2 = scmp.lt.s32.totalorder %s714_s22, %s714_s22 }
  0x1e   : > { %p526_p9 = scmp.ne.s32.totalorder %s714_s22, %s525_s7  ;;  %p534_p6 = scmp.lt.s32.totalorder %s525_s7, %s525_s7 }
  0x20   : > { %p528_p10 = pnand %p526_p9, %p514_p13  ;;  %p535_p4 = por %p534_p6, %p533_p2 }
  0x22   : > { %p529_p1 = pneg %p528_p10 }
  0x24   : > { %p536_p8 = pnand %p535_p4, %p529_p1 }
  0x26   : > { %539 = shalt.err (!%p536_p8)
}
  0x27   : > { %s643_s8 = smov 128   ;;  %s644_s9 = smov 8  }
  0x28   : > { %457 = dma.hbm_to_vmem [thread:$0]  (!%p721_p11), %s877_s1, 512, %s714_s22, [#allocation6], %s643_s8, %s643_s8, %s644_s9  }
  0x29   : > { %p25_p2 = scmp.eq.s32.totalorder %s24_s26, 0  ;;  %p34_p1 = scmp.ne.s32.totalorder %s636_s14, %s632_s13 }
  0x2a   : > { %p35_p4 = scmp.eq.s32.totalorder %s640_s15, 0  ;;  %p467_p6 = scmp.lt.s32.totalorder %s640_s15, 2 }
  0x2b   : > { %s757_s17 = scalar_select %p25_p2, %s636_s14, %s27_s25  }
  0x2c   : > { %p36_p8 = por %p35_p4, %p34_p1  ;;  %p887_p10 = scmp.eq.s32.totalorder %s691_s16, 1 }
  0x2d   : > { %s148_s27 = sand.u32 1, %s636_s14   ;;  %s414_s28 = sshll.u32 %s640_s15, 7 }
  0x2e   : > { %p761_p12 = por %p887_p10, %p34_p1  ;;  %s413_s29 = sshll.u32 %s148_s27, 3 }
  0x2f   : > { %s770_s4 = scalar_lea.hbm %s876_s0, %s414_s28  ;;  %s152_s22 = scalar_lea.vmem [#allocation2], %s413_s29 }
  0x30   : > { %s159_s25 = sshll.u32 %s152_s22, 4  ;;  %p772_p11 = pnand %p467_p6, %p36_p8  ;;  %s776_s25 = int_to_ptr.vmem [resolvable:$true] %s159_s25 }
  0x31   : > { %s149_s5 = scalar_lea.sflag [#allocation3], %s148_s27  ;;  %s540_s6 = scalar_lea.hbm %s770_s4, 128 }
  0x32   : > { %p541_p13 = scmp.ne.s32.totalorder %s770_s4, %s540_s6  ;;  %p542_p0 = pneg %p772_p11 }
  0x33   : > { %s545_s9 = scalar_lea.hbm %s876_s0, 256  ;;  %p546_p7 = scmp.lt.u32.totalorder %s770_s4, %s876_s0 }
  0x34   : > { %p543_p3 = pnand %p542_p0, %p541_p13  ;;  %p547_p9 = scmp.lt.u32.totalorder %s545_s9, %s540_s6 }
  0x35   : > { %p549_p1 = scmp.lt.u32.totalorder %s540_s6, %s770_s4 }
  0x36   : > { %p544_p5 = pneg %p543_p3  ;;  %p548_p2 = por %p547_p9, %p546_p7 }
  0x38   : > { %p550_p4 = por %p549_p1, %p548_p2 }
  0x3a   : > { %p551_p6 = pnand %p550_p4, %p544_p5 }
  0x3c   : > { %554 = shalt.err (!%p551_p6)
}
  0x3d   : > { %s555_s27 = scalar_lea.vmem %s776_s25, 128  ;;  %s645_s28 = smov [#allocation2]  }
  0x3e   : > { %p556_p8 = scmp.ne.s32.totalorder %s776_s25, %s555_s27  ;;  %s560_s29 = sshll.u32 %s645_s28, 4  ;;  %s561_s29 = int_to_ptr.vmem [resolvable:$false] %s560_s29 }
  0x3f   : > { %s562_s23 = scalar_lea.vmem %s561_s29, 256  ;;  %p563_p3 = scmp.lt.s32.totalorder %s776_s25, %s561_s29 }
  0x40   : > { %p558_p10 = pnand %p556_p8, %p542_p0  ;;  %p564_p7 = scmp.lt.s32.totalorder %s562_s23, %s555_s27 }
  0x42   : > { %p559_p13 = pneg %p558_p10  ;;  %p565_p9 = por %p564_p7, %p563_p3 }
  0x44   : > { %p566_p2 = pnand %p565_p9, %p559_p13 }
  0x46   : > { %569 = shalt.err (!%p566_p2)
}
  0x47   : > { %461 = dma.hbm_to_vmem [thread:$0]  (!%p772_p11), %s770_s4, 128, %s776_s25, %s149_s5  }
  0x48   : > { %p890_p5 = scmp.ne.s32.totalorder %s885_s20, 0 }
  0x49   : > { %s806_s30 = sand.u32 (!%p890_p5), 1, %s632_s13   ;;  %p891_p0 = scmp.ne.s32.totalorder (!%p890_p5), %s883_s18, 0 }
  0x4a   : > { %168 = sbr.rel (%p890_p5) target bundleno = 653 (0x28d), region = 32  ;;  %s416_s22 = sshll.u32 (!%p890_p5), %s806_s30, 3 }
  0x4b   : > { %s171_s6 = scalar_lea.sflag (!%p890_p5), [#allocation3], %s806_s30  ;;  %s174_s7 = scalar_lea.vmem (!%p890_p5), [#allocation2], %s416_s22 }
  0x51   : > { %615 = dma.done.wait (%p891_p0), %s171_s6, 128  }
  0x52   : > { %617 = vsyncadd (%p891_p0), %s171_s6, 4294967168  ;;  %p892_p11 = scmp.eq.s32.totalorder %s691_s16, 0 }
  0x54   : > { %619 = dma.done.wait (%p892_p11), [#allocation6], 512   ;;  %p893_p1 = pmov %p892_p11 }
  0x55   : > { %v646_v0 = vmov 0.0|0.0   ;;  %vm647_vm0 = vmmov 0   ;;  %v648_v1 = vmov 0.0   ;;  %v202_v2 = vld [vmem:[#allocation5] sm:$0xff]  ;;  %v203_v3 = vld [vmem:[#allocation5 + $0x8] sm:$0xff]  ;;  %v204_v4 = vld [vmem:[#allocation5 + $0x10] sm:$0xff]  ;;  %v207_v9 = vlaneseq }
  0x56   : > { %621 = vsyncadd (%p893_p1), [#allocation6], 4294966784  ;;  %440 = vmatprep.subr.bf16.mxu0 %v646_v0  ;;  %437 = vmatprep.mubr.msk.f32.mxu0 %vm647_vm0, %v648_v1  ;;  %v441_v5 = vpack.c.bf16 %v203_v3, %v202_v2  ;;  %v205_v6 = vld [vmem:[#allocation5 + $0x18] sm:$0xff]  ;;  %vm211_vm1 = vcmask 261120   ;;  %v206_v12 = vld [vmem:[%s878_s2] sm:$0x7] }
  0x57   : > { %v444_v7 = vpack.c.bf16 %v205_v6, %v204_v4  ;;  %v201_v8 = vld [vmem:[%s174_s7] sm:$0xff]  ;;  %v208_v10 = vshrl.u32 %v207_v9, 7  ;;  %vm285_vm2 = vcmask 523264   ;;  %s421_s4 = sshll.u32 %s691_s16, 7  ;;  %s200_s25 = scalar_lea.vmem [#allocation7], %s416_s22 }
  0x58   : > { %442 = vmatpush3.bf16.msra.mxu0 %v441_v5  ;;  %s329_s26 = sshll.u32 %s200_s25, 4  ;;  %s831_s9 = scalar_lea.hbm %s879_s3, %s421_s4  ;;  %s833_s26 = int_to_ptr.vmem [resolvable:$true] %s329_s26 }
  0x59   : > { %443 = vmatprep.subr.bf16.mxu0 %v646_v0  ;;  %v209_v11 = vsub.s32 0, %v208_v10  ;;  %v301_v26 = vsub.s32 1, %v208_v10  ;;  %v306_v27 = vsub.s32 2, %v208_v10  ;;  %s316_s10 = scalar_lea.sflag [#allocation4], %s806_s30  ;;  %s570_s16 = scalar_lea.vmem %s833_s26, 128 }
  0x5a   : > { %p571_p4 = scmp.ne.s32.totalorder %s833_s26, %s570_s16  ;;  %s649_s11 = smov [#allocation7]  }
  0x5b   : > { %v210_v13 = vrot.slane %v206_v12, %v209_v11  ;;  %v302_v28 = vrot.slane %v206_v12, %v301_v26  ;;  %v307_v30 = vrot.slane %v206_v12, %v306_v27  ;;  %s574_s27 = sshll.u32 %s649_s11, 4  ;;  %s575_s27 = int_to_ptr.vmem [resolvable:$false] %s574_s27 }
  0x5c   : > { %445 = vmatpush3.bf16.msra.mxu0 %v444_v7  ;;  %p572_p6 = pnand %p571_p4, %p761_p12  ;;  %s576_s28 = scalar_lea.vmem %s575_s27, 256 }
  0x5d   : > { %p577_p10 = scmp.lt.s32.totalorder %s833_s26, %s575_s27  ;;  %p578_p13 = scmp.lt.s32.totalorder %s576_s28, %s570_s16 }
  0x5e   : > { %p573_p8 = pneg %p572_p6 }
  0x5f   : > { %438 = vmatmul.mubr.msk.f32.vlgmr.msra.gmra.mrb[0].mxu0 %vm211_vm1, %v201_v8  ;;  %p579_p3 = por %p578_p13, %p577_p10 }
  0x61   : > { %p580_p7 = pnand %p579_p3, %p573_p8 }
 0x132   : > { %v281_v14 = vpop.f32.mrb[0].mxu0 }
 0x133   : > { %v282_v15 = vadd.f32 %v281_v14, %v210_v13  ;;  %v439_v16 = vpop.f32.mrb[1].mxu0 }
 0x135   : > { %v286_v17 = vsel %vm285_vm2, %v282_v15, 0.0 }
 0x136   : > { %287 = vadd.xlane.f32.xlu0 %v286_v17 }
 0x1c3   : > { %v288_v18 = vpop.xlane.xlu0 %287 }
 0x1c4   : > { %v289_v19 = vmul.f32 0.015625, %v288_v18 }
 0x1c6   : > { %v290_v20 = vsub.f32 %v282_v15, %v289_v19 }
 0x1c8   : > { %v291_v21 = vmul.f32 %v290_v20, %v290_v20 }
 0x1ca   : > { %v292_v22 = vsel %vm285_vm2, %v291_v21, 0.0 }
 0x1cb   : > { %293 = vadd.xlane.f32.xlu0 %v292_v22 }
 0x258   : > { %v294_v23 = vpop.xlane.xlu0 %293 }
 0x259   : > { %v295_v24 = vmul.f32 0.015625, %v294_v23 }
 0x25b   : > { %v296_v25 = vadd.f32 1e-05, %v295_v24 }
 0x25d   : > { %508 = vrsqrt.f32 %v296_v25 }
 0x267   : > { %v509_v29 = vpop.eup %508 }
 0x268   : > { %v298_v31 = vmul.f32 %v509_v29, %v290_v20 }
 0x26a   : > { %v303_v32 = vmul.f32 %v302_v28, %v298_v31 }
 0x26c   : > { %v308_v33 = vadd.f32 %v307_v30, %v303_v32 }
 0x26e   : > { %v310_v34 = vmul.f32 0.70710677, %v308_v33  ;;  %v309_v36 = vmul.f32 0.5, %v308_v33 }
 0x270   : > { %510 = verf.f32 %v310_v34 }
 0x27a   : > { %v511_v35 = vpop.eup %510 }
 0x27b   : > { %v312_v37 = vadd.f32 1.0, %v511_v35 }
 0x27d   : > { %v313_v38 = vmul.f32 %v312_v37, %v309_v36 }
 0x27f   : > { %314 = vst.msk [vmem:[%s200_s25] sm:$0xff] %vm285_vm2, %v313_v38 }
 0x280   : > { %583 = shalt.err (!%p580_p7)
}
 0x281   : > { %s584_s29 = scalar_lea.hbm %s831_s9, 128  ;;  %s588_s22 = scalar_lea.hbm %s879_s3, 256 }
 0x282   : > { %p585_p9 = scmp.ne.s32.totalorder %s831_s9, %s584_s29  ;;  %p589_p0 = scmp.lt.u32.totalorder %s831_s9, %s879_s3 }
 0x283   : > { %p590_p11 = scmp.lt.u32.totalorder %s588_s22, %s584_s29  ;;  %p592_p4 = scmp.lt.u32.totalorder %s584_s29, %s831_s9 }
 0x284   : > { %p586_p2 = pnand %p585_p9, %p761_p12 }
 0x285   : > { %p591_p1 = por %p590_p11, %p589_p0 }
 0x286   : > { %p587_p5 = pneg %p586_p2 }
 0x287   : > { %p593_p6 = por %p592_p4, %p591_p1 }
 0x289   : > { %p594_p8 = pnand %p593_p6, %p587_p5 }
 0x28b   : > { %597 = shalt.err (!%p594_p8)
}
 0x28c   : > { %452 = dma.vmem_to_hbm [thread:$0]  (%p761_p12), %s833_s26, 128, %s831_s9, %s316_s10  }
 0x28d PF: > { %s341_s18 = sand.u32 1, %s628_s12   ;;  %p894_p10 = scmp.ne.s32.totalorder %s884_s19, 0 }
 0x28e   : > { %p895_p13 = scmp.ge.s32.totalorder %s640_s15, 2  ;;  %s342_s20 = scalar_lea.sflag [#allocation4], %s341_s18 }
 0x290   : > { %p463_p3 = pnand %p895_p13, %p894_p10 }
 0x292   : > { %623 = dma.done.wait (!%p463_p3), %s342_s20, 128  }
 0x293   : > { %625 = vsyncadd (!%p463_p3), %s342_s20, 4294967168  ;;  %p17_p7 = scmp.ge.s32.totalorder %s726_s24, 4   ;;  %s896_s12 = smov %s632_s13 }
 0x294   : > { %s897_s13 = smov %s636_s14  ;;  %s898_s14 = smov %s757_s17 }
 0x295   : > { %s899_s15 = smov %s726_s24  ;;  %19 = sbr.rel (!%p17_p7) target bundleno = 6 (0x6), region = 81 }
 0x29c   :  { %347 = vsyncpa [#allocation3], 1 }
 0x29d   :  { %349 = vsyncpa [#allocation3 + $0x1], 1 }
 0x29e   :  { %350 = vsyncpa [#allocation6], 1 }
 0x29f   :  { %351 = vsyncpa [#allocation4], 1 }
 0x2a0   :  { %353 = vsyncpa [#allocation4 + $0x1], 1 }

// kernel: tpu_custom_call.1
= control target key start
LH: loop header
LB: loop body
LE: loop exit
PB: predicated region body
PF: predicated region fallthrough
CT: control target
= control target key end

     0   :  { %8 = vsyncpa [#allocation3], 0  ;;  %s876_s0 = inlined_call_operand.hbm [shape: f32[16,32], index: 0, kind: input, shape index: {}]   ;;  %s877_s1 = inlined_call_operand.hbm [shape: f32[32,64], index: 1, kind: input, shape index: {}]   ;;  %s878_s2 = inlined_call_operand.vmem [shape: f32[3,64], index: 2, kind: input, shape index: {}]   ;;  %s879_s3 = inlined_call_operand.hbm [shape: f32[16,64], index: 3, kind: output, shape index: {}]  }
   0x1   :  { %10 = vsyncpa [#allocation3 + $0x1], 0 }
   0x2   :  { %11 = vsyncpa [#allocation6], 0 }
   0x3   :  { %12 = vsyncpa [#allocation4], 0 }
   0x4   :  { %14 = vsyncpa [#allocation4 + $0x1], 0  ;;  %s670_s12 = smov 0   ;;  %s672_s13 = smov 0  }
   0x5   :  { %s674_s14 = smov 0   ;;  %s676_s15 = smov 0  }
   0x6 LB: > { %s691_s16 = sadd.s32 4294967295, %s640_s15   ;;  %s409_s17 = sadd.s32 4294967294, %s640_s15   ;;  %s640_s15 = sphi %s676_s15, %s899_s15   ;;  %s636_s14 = sphi %s674_s14, %s898_s14   ;;  %s632_s13 = sphi %s672_s13, %s897_s13   ;;  %s628_s12 = sphi %s670_s12, %s896_s12  }
   0x7   : > { %p40_p0 = scmp.ne.s32.totalorder %s632_s13, %s628_s12  ;;  %p880_p1 = scmp.eq.s32.totalorder %s691_s16, 0 }
   0x8   : > { %p112_p3 = scmp.eq.s32.totalorder %s409_s17, 1  ;;  %p410_p5 = scmp.ge.s32.totalorder %s640_s15, 1 }
   0x9   : > { %p700_p4 = por %p880_p1, %p40_p0  ;;  %p119_p7 = scmp.lt.s32.totalorder %s640_s15, 3 }
   0xa   : > { %p705_p6 = por %p112_p3, %p40_p0  ;;  %s642_s21 = smov [#allocation5]  }
   0xb   : > { %s883_s18 = scalar_select %p700_p4, 1, 0 }
   0xc   : > { %s884_s19 = scalar_select %p705_p6, 1, 0 }
   0xd   : > { %p710_p8 = pnand %p410_p5, %p119_p7  ;;  %s131_s22 = sshll.u32 %s642_s21, 4  ;;  %s714_s22 = int_to_ptr.vmem [resolvable:$true] %s131_s22 }
   0xe   : > { %s726_s24 = sadd.s32 1, %s640_s15   ;;  %s27_s25 = sadd.s32 1, %s636_s14 }
   0xf   : > { %s885_s20 = scalar_select %p710_p8, 1, 0 }
  0x10   : > { %p454_p9 = pneg %p710_p8  ;;  %s24_s26 = ssub.s32 %s640_s15, %s726_s24 }
  0x11   : > { %s512_s29 = scalar_lea.hbm %s877_s1, 512 }
  0x12   : > { %p721_p11 = pnand %p454_p9, %p880_p1  ;;  %p513_p12 = scmp.ne.s32.totalorder %s877_s1, %s512_s29 }
  0x13   : > { %p519_p5 = scmp.lt.u32.totalorder %s512_s29, %s877_s1 }
  0x14   : > { %p514_p13 = pneg %p721_p11 }
  0x16   : > { %p515_p0 = pnand %p514_p13, %p513_p12 }
  0x18   : > { %p516_p3 = pneg %p515_p0 }
  0x1a   : > { %p521_p7 = pnand %p519_p5, %p516_p3 }
  0x1c   : > { %524 = shalt.err (!%p521_p7)
}
  0x1d   : > { %s525_s7 = scalar_lea.vmem %s714_s22, 512  ;;  %p533_p2 = scmp.lt.s32.totalorder %s714_s22, %s714_s22 }
  0x1e   : > { %p526_p9 = scmp.ne.s32.totalorder %s714_s22, %s525_s7  ;;  %p534_p6 = scmp.lt.s32.totalorder %s525_s7, %s525_s7 }
  0x20   : > { %p528_p10 = pnand %p526_p9, %p514_p13  ;;  %p535_p4 = por %p534_p6, %p533_p2 }
  0x22   : > { %p529_p1 = pneg %p528_p10 }
  0x24   : > { %p536_p8 = pnand %p535_p4, %p529_p1 }
  0x26   : > { %539 = shalt.err (!%p536_p8)
}
  0x27   : > { %s643_s8 = smov 128   ;;  %s644_s9 = smov 8  }
  0x28   : > { %457 = dma.hbm_to_vmem [thread:$0]  (!%p721_p11), %s877_s1, 512, %s714_s22, [#allocation6], %s643_s8, %s643_s8, %s644_s9  }
  0x29   : > { %p25_p2 = scmp.eq.s32.totalorder %s24_s26, 0  ;;  %p34_p1 = scmp.ne.s32.totalorder %s636_s14, %s632_s13 }
  0x2a   : > { %p35_p4 = scmp.eq.s32.totalorder %s640_s15, 0  ;;  %p467_p6 = scmp.lt.s32.totalorder %s640_s15, 2 }
  0x2b   : > { %s757_s17 = scalar_select %p25_p2, %s636_s14, %s27_s25  }
  0x2c   : > { %p36_p8 = por %p35_p4, %p34_p1  ;;  %p887_p10 = scmp.eq.s32.totalorder %s691_s16, 1 }
  0x2d   : > { %s148_s27 = sand.u32 1, %s636_s14   ;;  %s414_s28 = sshll.u32 %s640_s15, 7 }
  0x2e   : > { %p761_p12 = por %p887_p10, %p34_p1  ;;  %s413_s29 = sshll.u32 %s148_s27, 3 }
  0x2f   : > { %s770_s4 = scalar_lea.hbm %s876_s0, %s414_s28  ;;  %s152_s22 = scalar_lea.vmem [#allocation2], %s413_s29 }
  0x30   : > { %s159_s25 = sshll.u32 %s152_s22, 4  ;;  %p772_p11 = pnand %p467_p6, %p36_p8  ;;  %s776_s25 = int_to_ptr.vmem [resolvable:$true] %s159_s25 }
  0x31   : > { %s149_s5 = scalar_lea.sflag [#allocation3], %s148_s27  ;;  %s540_s6 = scalar_lea.hbm %s770_s4, 128 }
  0x32   : > { %p541_p13 = scmp.ne.s32.totalorder %s770_s4, %s540_s6  ;;  %p542_p0 = pneg %p772_p11 }
  0x33   : > { %s545_s9 = scalar_lea.hbm %s876_s0, 256  ;;  %p546_p7 = scmp.lt.u32.totalorder %s770_s4, %s876_s0 }
  0x34   : > { %p543_p3 = pnand %p542_p0, %p541_p13  ;;  %p547_p9 = scmp.lt.u32.totalorder %s545_s9, %s540_s6 }
  0x35   : > { %p549_p1 = scmp.lt.u32.totalorder %s540_s6, %s770_s4 }
  0x36   : > { %p544_p5 = pneg %p543_p3  ;;  %p548_p2 = por %p547_p9, %p546_p7 }
  0x38   : > { %p550_p4 = por %p549_p1, %p548_p2 }
  0x3a   : > { %p551_p6 = pnand %p550_p4, %p544_p5 }
  0x3c   : > { %554 = shalt.err (!%p551_p6)
}
  0x3d   : > { %s555_s27 = scalar_lea.vmem %s776_s25, 128  ;;  %s645_s28 = smov [#allocation2]  }
  0x3e   : > { %p556_p8 = scmp.ne.s32.totalorder %s776_s25, %s555_s27  ;;  %s560_s29 = sshll.u32 %s645_s28, 4  ;;  %s561_s29 = int_to_ptr.vmem [resolvable:$false] %s560_s29 }
  0x3f   : > { %s562_s23 = scalar_lea.vmem %s561_s29, 256  ;;  %p563_p3 = scmp.lt.s32.totalorder %s776_s25, %s561_s29 }
  0x40   : > { %p558_p10 = pnand %p556_p8, %p542_p0  ;;  %p564_p7 = scmp.lt.s32.totalorder %s562_s23, %s555_s27 }
  0x42   : > { %p559_p13 = pneg %p558_p10  ;;  %p565_p9 = por %p564_p7, %p563_p3 }
  0x44   : > { %p566_p2 = pnand %p565_p9, %p559_p13 }
  0x46   : > { %569 = shalt.err (!%p566_p2)
}
  0x47   : > { %461 = dma.hbm_to_vmem [thread:$0]  (!%p772_p11), %s770_s4, 128, %s776_s25, %s149_s5  }
  0x48   : > { %p890_p5 = scmp.ne.s32.totalorder %s885_s20, 0 }
  0x49   : > { %s806_s30 = sand.u32 (!%p890_p5), 1, %s632_s13   ;;  %p891_p0 = scmp.ne.s32.totalorder (!%p890_p5), %s883_s18, 0 }
  0x4a   : > { %168 = sbr.rel (%p890_p5) target bundleno = 653 (0x28d), region = 32  ;;  %s416_s22 = sshll.u32 (!%p890_p5), %s806_s30, 3 }
  0x4b   : > { %s171_s6 = scalar_lea.sflag (!%p890_p5), [#allocation3], %s806_s30  ;;  %s174_s7 = scalar_lea.vmem (!%p890_p5), [#allocation2], %s416_s22 }
  0x51   : > { %615 = dma.done.wait (%p891_p0), %s171_s6, 128  }
  0x52   : > { %617 = vsyncadd (%p891_p0), %s171_s6, 4294967168  ;;  %p892_p11 = scmp.eq.s32.totalorder %s691_s16, 0 }
  0x54   : > { %619 = dma.done.wait (%p892_p11), [#allocation6], 512   ;;  %p893_p1 = pmov %p892_p11 }
  0x55   : > { %v646_v0 = vmov 0.0|0.0   ;;  %vm647_vm0 = vmmov 0   ;;  %v648_v1 = vmov 0.0   ;;  %v202_v2 = vld [vmem:[#allocation5] sm:$0xff]  ;;  %v203_v3 = vld [vmem:[#allocation5 + $0x8] sm:$0xff]  ;;  %v204_v4 = vld [vmem:[#allocation5 + $0x10] sm:$0xff]  ;;  %v207_v9 = vlaneseq }
  0x56   : > { %621 = vsyncadd (%p893_p1), [#allocation6], 4294966784  ;;  %440 = vmatprep.subr.bf16.mxu0 %v646_v0  ;;  %437 = vmatprep.mubr.msk.f32.mxu0 %vm647_vm0, %v648_v1  ;;  %v441_v5 = vpack.c.bf16 %v203_v3, %v202_v2  ;;  %v205_v6 = vld [vmem:[#allocation5 + $0x18] sm:$0xff]  ;;  %vm211_vm1 = vcmask 261120   ;;  %v206_v12 = vld [vmem:[%s878_s2] sm:$0x7] }
  0x57   : > { %v444_v7 = vpack.c.bf16 %v205_v6, %v204_v4  ;;  %v201_v8 = vld [vmem:[%s174_s7] sm:$0xff]  ;;  %v208_v10 = vshrl.u32 %v207_v9, 7  ;;  %vm285_vm2 = vcmask 523264   ;;  %s421_s4 = sshll.u32 %s691_s16, 7  ;;  %s200_s25 = scalar_lea.vmem [#allocation7], %s416_s22 }
  0x58   : > { %442 = vmatpush3.bf16.msra.mxu0 %v441_v5  ;;  %s329_s26 = sshll.u32 %s200_s25, 4  ;;  %s831_s9 = scalar_lea.hbm %s879_s3, %s421_s4  ;;  %s833_s26 = int_to_ptr.vmem [resolvable:$true] %s329_s26 }
  0x59   : > { %443 = vmatprep.subr.bf16.mxu0 %v646_v0  ;;  %v209_v11 = vsub.s32 0, %v208_v10  ;;  %v301_v26 = vsub.s32 1, %v208_v10  ;;  %v306_v27 = vsub.s32 2, %v208_v10  ;;  %s316_s10 = scalar_lea.sflag [#allocation4], %s806_s30  ;;  %s570_s16 = scalar_lea.vmem %s833_s26, 128 }
  0x5a   : > { %p571_p4 = scmp.ne.s32.totalorder %s833_s26, %s570_s16  ;;  %s649_s11 = smov [#allocation7]  }
  0x5b   : > { %v210_v13 = vrot.slane %v206_v12, %v209_v11  ;;  %v302_v28 = vrot.slane %v206_v12, %v301_v26  ;;  %v307_v30 = vrot.slane %v206_v12, %v306_v27  ;;  %s574_s27 = sshll.u32 %s649_s11, 4  ;;  %s575_s27 = int_to_ptr.vmem [resolvable:$false] %s574_s27 }
  0x5c   : > { %445 = vmatpush3.bf16.msra.mxu0 %v444_v7  ;;  %p572_p6 = pnand %p571_p4, %p761_p12  ;;  %s576_s28 = scalar_lea.vmem %s575_s27, 256 }
  0x5d   : > { %p577_p10 = scmp.lt.s32.totalorder %s833_s26, %s575_s27  ;;  %p578_p13 = scmp.lt.s32.totalorder %s576_s28, %s570_s16 }
  0x5e   : > { %p573_p8 = pneg %p572_p6 }
  0x5f   : > { %438 = vmatmul.mubr.msk.f32.vlgmr.msra.gmra.mrb[0].mxu0 %vm211_vm1, %v201_v8  ;;  %p579_p3 = por %p578_p13, %p577_p10 }
  0x61   : > { %p580_p7 = pnand %p579_p3, %p573_p8 }
 0x132   : > { %v281_v14 = vpop.f32.mrb[0].mxu0 }
 0x133   : > { %v282_v15 = vadd.f32 %v281_v14, %v210_v13  ;;  %v439_v16 = vpop.f32.mrb[1].mxu0 }
 0x135   : > { %v286_v17 = vsel %vm285_vm2, %v282_v15, 0.0 }
 0x136   : > { %287 = vadd.xlane.f32.xlu0 %v286_v17 }
 0x1c3   : > { %v288_v18 = vpop.xlane.xlu0 %287 }
 0x1c4   : > { %v289_v19 = vmul.f32 0.015625, %v288_v18 }
 0x1c6   : > { %v290_v20 = vsub.f32 %v282_v15, %v289_v19 }
 0x1c8   : > { %v291_v21 = vmul.f32 %v290_v20, %v290_v20 }
 0x1ca   : > { %v292_v22 = vsel %vm285_vm2, %v291_v21, 0.0 }
 0x1cb   : > { %293 = vadd.xlane.f32.xlu0 %v292_v22 }
 0x258   : > { %v294_v23 = vpop.xlane.xlu0 %293 }
 0x259   : > { %v295_v24 = vmul.f32 0.015625, %v294_v23 }
 0x25b   : > { %v296_v25 = vadd.f32 1e-05, %v295_v24 }
 0x25d   : > { %508 = vrsqrt.f32 %v296_v25 }
 0x267   : > { %v509_v29 = vpop.eup %508 }
 0x268   : > { %v298_v31 = vmul.f32 %v509_v29, %v290_v20 }
 0x26a   : > { %v303_v32 = vmul.f32 %v302_v28, %v298_v31 }
 0x26c   : > { %v308_v33 = vadd.f32 %v307_v30, %v303_v32 }
 0x26e   : > { %v310_v34 = vmul.f32 0.70710677, %v308_v33  ;;  %v309_v36 = vmul.f32 0.5, %v308_v33 }
 0x270   : > { %510 = verf.f32 %v310_v34 }
 0x27a   : > { %v511_v35 = vpop.eup %510 }
 0x27b   : > { %v312_v37 = vadd.f32 1.0, %v511_v35 }
 0x27d   : > { %v313_v38 = vmul.f32 %v312_v37, %v309_v36 }
 0x27f   : > { %314 = vst.msk [vmem:[%s200_s25] sm:$0xff] %vm285_vm2, %v313_v38 }
 0x280   : > { %583 = shalt.err (!%p580_p7)
}
 0x281   : > { %s584_s29 = scalar_lea.hbm %s831_s9, 128  ;;  %s588_s22 = scalar_lea.hbm %s879_s3, 256 }
 0x282   : > { %p585_p9 = scmp.ne.s32.totalorder %s831_s9, %s584_s29  ;;  %p589_p0 = scmp.lt.u32.totalorder %s831_s9, %s879_s3 }
 0x283   : > { %p590_p11 = scmp.lt.u32.totalorder %s588_s22, %s584_s29  ;;  %p592_p4 = scmp.lt.u32.totalorder %s584_s29, %s831_s9 }
 0x284   : > { %p586_p2 = pnand %p585_p9, %p761_p12 }
 0x285   : > { %p591_p1 = por %p590_p11, %p589_p0 }
 0x286   : > { %p587_p5 = pneg %p586_p2 }
 0x287   : > { %p593_p6 = por %p592_p4, %p591_p1 }
 0x289   : > { %p594_p8 = pnand %p593_p6, %p587_p5 }
 0x28b   : > { %597 = shalt.err (!%p594_p8)
}
 0x28c   : > { %452 = dma.vmem_to_hbm [thread:$0]  (%p761_p12), %s833_s26, 128, %s831_s9, %s316_s10  }
 0x28d PF: > { %s341_s18 = sand.u32 1, %s628_s12   ;;  %p894_p10 = scmp.ne.s32.totalorder %s884_s19, 0 }
 0x28e   : > { %p895_p13 = scmp.ge.s32.totalorder %s640_s15, 2  ;;  %s342_s20 = scalar_lea.sflag [#allocation4], %s341_s18 }
 0x290   : > { %p463_p3 = pnand %p895_p13, %p894_p10 }
 0x292   : > { %623 = dma.done.wait (!%p463_p3), %s342_s20, 128  }
 0x293   : > { %625 = vsyncadd (!%p463_p3), %s342_s20, 4294967168  ;;  %p17_p7 = scmp.ge.s32.totalorder %s726_s24, 4   ;;  %s896_s12 = smov %s632_s13 }
 0x294   : > { %s897_s13 = smov %s636_s14  ;;  %s898_s14 = smov %s757_s17 }
 0x295   : > { %s899_s15 = smov %s726_s24  ;;  %19 = sbr.rel (!%p17_p7) target bundleno = 6 (0x6), region = 81 }
 0x29c   :  { %347 = vsyncpa [#allocation3], 1 }
 0x29d   :  { %349 = vsyncpa [#allocation3 + $0x1], 1 }
 0x29e   :  { %350 = vsyncpa [#allocation6], 1 }
 0x29f   :  { %351 = vsyncpa [#allocation4], 1 }
 0x2a0   :  { %353 = vsyncpa [#allocation4 + $0x1], 1 }

</bundles_post_ra>
